<compile_context>
chip_gen: v7x
topology: tpu7x:2x2x1
jax: 0.10.0
libtpu: 0.0.40
codegen_flags: <defaults>
</compile_context>

<pallas_src>
import jax
import jax.numpy as jnp
from jax.experimental import pallas as pl
from jax.experimental.pallas import tpu as pltpu

EPS = 1e-5


def _round_up(n, m):
    return ((n + m - 1) // m) * m


# ---------------------------------------------------------------------------
# Kernel: fused 3-layer MLP (BN already folded into the weights).
# ---------------------------------------------------------------------------
def _mlp_kernel(x_ref, w1_ref, b1_ref, w2_ref, b2_ref, w3_ref, b3_ref, o_ref):
    # Layer 1: Linear(2*n_factors -> H1) [+ folded BN] + ReLU.
    # bf16 operands, f32 accumulation on the MXU.
    h = jnp.dot(x_ref[...], w1_ref[...], preferred_element_type=jnp.float32)
    h = jnp.maximum(h + b1_ref[...], 0.0)

    # Layer 2: Linear(H1 -> H2) [+ folded BN] + ReLU.
    h = jnp.dot(h.astype(w2_ref.dtype), w2_ref[...],
                preferred_element_type=jnp.float32)
    h = jnp.maximum(h + b2_ref[...], 0.0)

    # Layer 3: Linear(H2 -> 1) + Sigmoid.
    out = jnp.dot(h.astype(w3_ref.dtype), w3_ref[...],
                  preferred_element_type=jnp.float32)
    o_ref[...] = jax.nn.sigmoid(out + b3_ref[...]).astype(o_ref.dtype)


# ---------------------------------------------------------------------------
# Parameter helpers.
# ---------------------------------------------------------------------------
def fold_bn_params(params, compute_dtype=jnp.bfloat16):
    """Fold eval-mode BatchNorm1d into the Linear weights; cast to compute dtype.

    W' = W * (gamma * rsqrt(var + eps))           (broadcast over out features)
    b' = (b - mean) * (gamma * rsqrt(var + eps)) + beta
    Biases stay f32 (added post-accumulation); weights/embeddings go to bf16.
    """
    s1 = params["gamma1"] * jax.lax.rsqrt(params["var1"] + EPS)
    s2 = params["gamma2"] * jax.lax.rsqrt(params["var2"] + EPS)
    return {
        "user_emb": params["user_emb"].astype(compute_dtype),
        "movie_emb": params["movie_emb"].astype(compute_dtype),
        "w1": (params["w1"] * s1).astype(compute_dtype),
        "b1": ((params["b1"] - params["mean1"]) * s1 + params["beta1"]).astype(jnp.float32),
        "w2": (params["w2"] * s2).astype(compute_dtype),
        "b2": ((params["b2"] - params["mean2"]) * s2 + params["beta2"]).astype(jnp.float32),
        "w3": params["w3"].astype(compute_dtype),
        "b3": params["b3"].astype(jnp.float32),
    }


# ---------------------------------------------------------------------------
# Forward pass wrapper.
# ---------------------------------------------------------------------------
def cf_regression_forward(users, movies, folded, *, tile_b=4096,
                          allow_input_fusion=True):
    """Eval-mode forward of CollaborativeFilteringRegression via a Pallas kernel.

    `folded` is the output of fold_bn_params(params).
    """
    # Embedding gather + concat (bf16).  Dropout layers are identity in eval
    # mode.  With allow_input_fusion + jit this producer may be fused into the
    # pallas_call input instead of round-tripping HBM.
    ue = jnp.take(folded["user_emb"], users, axis=0)     # (B, n_factors)
    me = jnp.take(folded["movie_emb"], movies, axis=0)   # (B, n_factors)
    x = jnp.concatenate([ue, me], axis=1)                # (B, 2*n_factors) bf16

    B, D = x.shape
    H1 = folded["w1"].shape[1]
    H2 = folded["w2"].shape[1]

    # Tile the batch.  No explicit padding: ragged batches rely on Pallas grid
    # boundary masking (partial last block reads garbage rows / skips OOB
    # writes; rows are fully independent so this is safe).
    if B <= tile_b:
        tb = B                       # single block; full-dim exemption
    else:
        tb = _round_up(tile_b, 8)    # sublane-aligned block
    grid = (pl.cdiv(B, tb),)

    def const_spec(shape):
        # Full-array block, constant index map: DMA'd once, stays VMEM-resident.
        return pl.BlockSpec(shape, lambda i: (0,) * len(shape))

    in_specs = [
        pl.BlockSpec((tb, D), lambda i: (i, 0)),    # x batch tile
        const_spec((D, H1)), const_spec((1, H1)),   # w1', b1'
        const_spec((H1, H2)), const_spec((1, H2)),  # w2', b2'
        const_spec((H2, 1)), const_spec((1, 1)),    # w3,  b3
    ]
    out_specs = pl.BlockSpec((tb, 1), lambda i: (i, 0))

    fusion = ([True] + [False] * 6) if allow_input_fusion else None

    fn = pl.pallas_call(
        _mlp_kernel,
        out_shape=jax.ShapeDtypeStruct((B, 1), jnp.float32),
        grid_spec=pltpu.PrefetchScalarGridSpec(
            num_scalar_prefetch=0,
            grid=grid,
            in_specs=in_specs,
            out_specs=out_specs,
        ),
        compiler_params=pltpu.CompilerParams(
            dimension_semantics=("parallel",),   # batch tiles shard across TCs (v7x)
            allow_input_fusion=fusion,
        ),
    )
    return fn(x, folded["w1"], folded["b1"], folded["w2"], folded["b2"],
              folded["w3"], folded["b3"])


# ---------------------------------------------------------------------------
# Init + references.
# ---------------------------------------------------------------------------
def _xavier_uniform(key, shape):
    fan_in, fan_out = shape[0], shape[1]
    limit = (6.0 / (fan_in + fan_out)) ** 0.5
    return jax.random.uniform(key, shape, jnp.float32, -limit, limit)


def init_params(key, n_users, n_movies, n_factors=50, hidden_layers=(32, 16)):
    h1, h2 = hidden_layers
    d_in = 2 * n_factors
    keys = jax.random.split(key, 8)
    return {
        "user_emb": _xavier_uniform(keys[0], (n_users, n_factors)),
        "movie_emb": _xavier_uniform(keys[1], (n_movies, n_factors)),
        "w1": _xavier_uniform(keys[2], (d_in, h1)),
        "b1": jax.random.normal(keys[3], (1, h1), jnp.float32) * 0.01,
        "gamma1": jnp.ones((1, h1), jnp.float32),
        "beta1": jnp.zeros((1, h1), jnp.float32),
        "mean1": jnp.zeros((1, h1), jnp.float32),
        "var1": jnp.ones((1, h1), jnp.float32),
        "w2": _xavier_uniform(keys[4], (h1, h2)),
        "b2": jax.random.normal(keys[5], (1, h2), jnp.float32) * 0.01,
        "gamma2": jnp.ones((1, h2), jnp.float32),
        "beta2": jnp.zeros((1, h2), jnp.float32),
        "mean2": jnp.zeros((1, h2), jnp.float32),
        "var2": jnp.ones((1, h2), jnp.float32),
        "w3": _xavier_uniform(keys[6], (h2, 1)),
        "b3": jax.random.normal(keys[7], (1, 1), jnp.float32) * 0.01,
    }


def _reference_forward_f32(users, movies, params):
    """Pure-JAX f32 reference with explicit eval-mode BatchNorm (module semantics)."""
    ue = jnp.take(params["user_emb"], users, axis=0)
    me = jnp.take(params["movie_emb"], movies, axis=0)
    x = jnp.concatenate([ue, me], axis=1)
    h = x @ params["w1"] + params["b1"]
    h = (h - params["mean1"]) / jnp.sqrt(params["var1"] + EPS) * params["gamma1"] + params["beta1"]
    h = jnp.maximum(h, 0.0)
    h = h @ params["w2"] + params["b2"]
    h = (h - params["mean2"]) / jnp.sqrt(params["var2"] + EPS) * params["gamma2"] + params["beta2"]
    h = jnp.maximum(h, 0.0)
    return jax.nn.sigmoid(h @ params["w3"] + params["b3"])


def _reference_forward_folded(users, movies, folded):
    """Pure-JAX reference mirroring the kernel numerics (bf16 ops, f32 accum)."""
    ue = jnp.take(folded["user_emb"], users, axis=0)
    me = jnp.take(folded["movie_emb"], movies, axis=0)
    x = jnp.concatenate([ue, me], axis=1)
    h = jnp.dot(x, folded["w1"], preferred_element_type=jnp.float32) + folded["b1"]
    h = jnp.maximum(h, 0.0).astype(folded["w2"].dtype)
    h = jnp.dot(h, folded["w2"], preferred_element_type=jnp.float32) + folded["b2"]
    h = jnp.maximum(h, 0.0).astype(folded["w3"].dtype)
    out = jnp.dot(h, folded["w3"], preferred_element_type=jnp.float32) + folded["b3"]
    return jax.nn.sigmoid(out)


if __name__ == "__main__":
    n_users, n_movies, n_factors = 20, 30, 50
    batch = 16

    key = jax.random.PRNGKey(0)
    pkey, ukey, mkey = jax.random.split(key, 3)
    params = init_params(pkey, n_users, n_movies, n_factors)
    folded = fold_bn_params(params)

    users = jax.random.randint(ukey, (batch,), 0, n_users, dtype=jnp.int32)
    movies = jax.random.randint(mkey, (batch,), 0, n_movies, dtype=jnp.int32)

    # --- Case 1: 8-aligned batch, single block (tile clamps to B).
    out = cf_regression_forward(users, movies, folded)
    out = jax.block_until_ready(out)
    assert out.shape == (batch, 1)

    ref_folded = _reference_forward_folded(users, movies, folded)
    ref_f32 = _reference_forward_f32(users, movies, params)
    assert jnp.allclose(out, ref_folded, atol=1e-4, rtol=1e-4), \
        "mismatch vs bf16 folded reference"
    assert jnp.allclose(out, ref_f32, atol=2e-2), \
        "mismatch vs f32 module reference"

    # --- Case 2: ragged batch (13) with small explicit tile -> multi-step
    # parallel grid with a masked partial last block (no wrapper padding).
    users2, movies2 = users[:13], movies[:13]
    out2 = cf_regression_forward(users2, movies2, folded, tile_b=8)
    out2 = jax.block_until_ready(out2)
    assert out2.shape == (13, 1)
    ref2 = _reference_forward_folded(users2, movies2, folded)
    assert jnp.allclose(out2, ref2, atol=1e-4, rtol=1e-4), \
        "mismatch vs reference on ragged batch (tiled)"

    # --- Case 3: ragged batch (13) with default tile -> single full-extent
    # (non-8-aligned) block.
    out3 = cf_regression_forward(users2, movies2, folded)
    out3 = jax.block_until_ready(out3)
    assert out3.shape == (13, 1)
    assert jnp.allclose(out3, ref2, atol=1e-4, rtol=1e-4), \
        "mismatch vs reference on ragged batch (single block)"

    print("KERNEL_OK")
</pallas_src>

<mosaic_0001>
module attributes {stable_mosaic.version = 11 : i64} {
  func.func @_mlp_kernel(%arg0: i32, %arg1: memref<16x100xbf16, #tpu.memory_space<vmem>>, %arg2: memref<100x32xbf16, #tpu.memory_space<vmem>>, %arg3: memref<1x32xf32, #tpu.memory_space<vmem>>, %arg4: memref<32x16xbf16, #tpu.memory_space<vmem>>, %arg5: memref<1x16xf32, #tpu.memory_space<vmem>>, %arg6: memref<16x1xbf16, #tpu.memory_space<vmem>>, %arg7: memref<1x1xf32, #tpu.memory_space<vmem>>, %arg8: memref<16x1xf32, #tpu.memory_space<vmem>>) attributes {dimension_semantics = [#tpu.dimension_semantics<parallel>], iteration_bounds = array<i64: 1>, scalar_prefetch = 0 : i64, scratch_operands = 0 : i64, tpu.core_type = #tpu.core_type<tc>, window_params = [{transform_indices = @transform_0, window_bounds = array<i64: 16, 100>}, {pipeline_mode = #tpu.pipeline_mode<synchronous>, transform_indices = @transform_1, window_bounds = array<i64: 100, 32>}, {pipeline_mode = #tpu.pipeline_mode<synchronous>, transform_indices = @transform_2, window_bounds = array<i64: 1, 32>}, {pipeline_mode = #tpu.pipeline_mode<synchronous>, transform_indices = @transform_3, window_bounds = array<i64: 32, 16>}, {pipeline_mode = #tpu.pipeline_mode<synchronous>, transform_indices = @transform_4, window_bounds = array<i64: 1, 16>}, {pipeline_mode = #tpu.pipeline_mode<synchronous>, transform_indices = @transform_5, window_bounds = array<i64: 16, 1>}, {pipeline_mode = #tpu.pipeline_mode<synchronous>, transform_indices = @transform_6, window_bounds = array<i64: 1, 1>}, {transform_indices = @transform_7, window_bounds = array<i64: 16, 1>}]} {
    %c0 = arith.constant 0 : index
    %c0_0 = arith.constant 0 : index
    %0 = vector.load %arg1[%c0, %c0_0] : memref<16x100xbf16, #tpu.memory_space<vmem>>, vector<16x100xbf16>
    %c0_1 = arith.constant 0 : index
    %c0_2 = arith.constant 0 : index
    %1 = vector.load %arg2[%c0_1, %c0_2] : memref<100x32xbf16, #tpu.memory_space<vmem>>, vector<100x32xbf16>
    %cst = arith.constant dense<0.000000e+00> : vector<16x32xf32>
    %2 = tpu.matmul %0, %1, %cst {dimension_numbers = #tpu.dot_dimension_numbers<[1], [0], [0], [1], [0, 0, 1, 1], [], []>} : vector<16x100xbf16>, vector<100x32xbf16>, vector<16x32xf32> -> vector<16x32xf32>
    %c0_3 = arith.constant 0 : index
    %c0_4 = arith.constant 0 : index
    %3 = vector.load %arg3[%c0_3, %c0_4] : memref<1x32xf32, #tpu.memory_space<vmem>>, vector<1x32xf32>
    %4 = vector.broadcast %3 : vector<1x32xf32> to vector<16x32xf32>
    %5 = arith.addf %2, %4 : vector<16x32xf32>
    %cst_5 = arith.constant 0.000000e+00 : f32
    %6 = vector.broadcast %cst_5 : f32 to vector<16x32xf32>
    %7 = arith.maximumf %5, %6 : vector<16x32xf32>
    %8 = arith.truncf %7 : vector<16x32xf32> to vector<16x32xbf16>
    %c0_6 = arith.constant 0 : index
    %c0_7 = arith.constant 0 : index
    %9 = vector.load %arg4[%c0_6, %c0_7] : memref<32x16xbf16, #tpu.memory_space<vmem>>, vector<32x16xbf16>
    %cst_8 = arith.constant dense<0.000000e+00> : vector<16x16xf32>
    %10 = tpu.matmul %8, %9, %cst_8 {dimension_numbers = #tpu.dot_dimension_numbers<[1], [0], [0], [1], [0, 0, 1, 1], [], []>} : vector<16x32xbf16>, vector<32x16xbf16>, vector<16x16xf32> -> vector<16x16xf32>
    %c0_9 = arith.constant 0 : index
    %c0_10 = arith.constant 0 : index
    %11 = vector.load %arg5[%c0_9, %c0_10] : memref<1x16xf32, #tpu.memory_space<vmem>>, vector<1x16xf32>
    %12 = vector.broadcast %11 : vector<1x16xf32> to vector<16x16xf32>
    %13 = arith.addf %10, %12 : vector<16x16xf32>
    %cst_11 = arith.constant 0.000000e+00 : f32
    %14 = vector.broadcast %cst_11 : f32 to vector<16x16xf32>
    %15 = arith.maximumf %13, %14 : vector<16x16xf32>
    %16 = arith.truncf %15 : vector<16x16xf32> to vector<16x16xbf16>
    %c0_12 = arith.constant 0 : index
    %c0_13 = arith.constant 0 : index
    %17 = vector.load %arg6[%c0_12, %c0_13] : memref<16x1xbf16, #tpu.memory_space<vmem>>, vector<16x1xbf16>
    %cst_14 = arith.constant dense<0.000000e+00> : vector<16x1xf32>
    %18 = tpu.matmul %16, %17, %cst_14 {dimension_numbers = #tpu.dot_dimension_numbers<[1], [0], [0], [1], [0, 0, 1, 1], [], []>} : vector<16x16xbf16>, vector<16x1xbf16>, vector<16x1xf32> -> vector<16x1xf32>
    %c0_15 = arith.constant 0 : index
    %c0_16 = arith.constant 0 : index
    %19 = vector.load %arg7[%c0_15, %c0_16] : memref<1x1xf32, #tpu.memory_space<vmem>>, vector<1x1xf32>
    %20 = vector.broadcast %19 : vector<1x1xf32> to vector<16x1xf32>
    %21 = arith.addf %18, %20 : vector<16x1xf32>
    %22 = arith.negf %21 : vector<16x1xf32>
    %23 = math.exp %22 : vector<16x1xf32>
    %cst_17 = arith.constant 1.000000e+00 : f32
    %24 = vector.broadcast %cst_17 : f32 to vector<16x1xf32>
    %25 = arith.addf %24, %23 : vector<16x1xf32>
    %26 = arith.divf %24, %25 : vector<16x1xf32>
    %c0_18 = arith.constant 0 : index
    %c0_19 = arith.constant 0 : index
    %27 = vector.load %arg8[%c0_18, %c0_19] : memref<16x1xf32, #tpu.memory_space<vmem>>, vector<16x1xf32>
    tpu.vector_store %arg8[%c0_18, %c0_19], %26 {strides = array<i32>} : memref<16x1xf32, #tpu.memory_space<vmem>>, vector<16x1xf32>,
    return
  }
  func.func @transform_0(%arg0: i32) -> (i32, i32) {
    %c0_i32 = arith.constant 0 : i32
    %c0_i32_0 = arith.constant 0 : i32
    return %arg0, %c0_i32 : i32, i32
  }
  func.func @transform_1(%arg0: i32) -> (i32, i32) {
    %c0_i32 = arith.constant 0 : i32
    %c0_i32_0 = arith.constant 0 : i32
    %c0_i32_1 = arith.constant 0 : i32
    return %c0_i32, %c0_i32_0 : i32, i32
  }
  func.func @transform_2(%arg0: i32) -> (i32, i32) {
    %c0_i32 = arith.constant 0 : i32
    %c0_i32_0 = arith.constant 0 : i32
    %c0_i32_1 = arith.constant 0 : i32
    return %c0_i32, %c0_i32_0 : i32, i32
  }
  func.func @transform_3(%arg0: i32) -> (i32, i32) {
    %c0_i32 = arith.constant 0 : i32
    %c0_i32_0 = arith.constant 0 : i32
    %c0_i32_1 = arith.constant 0 : i32
    return %c0_i32, %c0_i32_0 : i32, i32
  }
  func.func @transform_4(%arg0: i32) -> (i32, i32) {
    %c0_i32 = arith.constant 0 : i32
    %c0_i32_0 = arith.constant 0 : i32
    %c0_i32_1 = arith.constant 0 : i32
    return %c0_i32, %c0_i32_0 : i32, i32
  }
  func.func @transform_5(%arg0: i32) -> (i32, i32) {
    %c0_i32 = arith.constant 0 : i32
    %c0_i32_0 = arith.constant 0 : i32
    %c0_i32_1 = arith.constant 0 : i32
    return %c0_i32, %c0_i32_0 : i32, i32
  }
  func.func @transform_6(%arg0: i32) -> (i32, i32) {
    %c0_i32 = arith.constant 0 : i32
    %c0_i32_0 = arith.constant 0 : i32
    %c0_i32_1 = arith.constant 0 : i32
    return %c0_i32, %c0_i32_0 : i32, i32
  }
  func.func @transform_7(%arg0: i32) -> (i32, i32) {
    %c0_i32 = arith.constant 0 : i32
    %c0_i32_0 = arith.constant 0 : i32
    return %arg0, %c0_i32 : i32, i32
  }
}

</mosaic_0001>

<bundles_post_ra>
// kernel: tpu_custom_call.1
= control target key start
LH: loop header
LB: loop body
LE: loop exit
PB: predicated region body
PF: predicated region fallthrough
CT: control target
= control target key end

     0   :  { %v382_v0 = vmov 0.0   ;;  %vm383_vm0 = vmmov 0   ;;  %vm99_vm1 = vcmask 1041408   ;;  %vm95_vm2 = vcmask 818176   ;;  %s475_s1 = inlined_call_operand.vmem [shape: bf16[100,32], index: 1, kind: input, shape index: {}]   ;;  %s476_s0 = inlined_call_operand.vmem [shape: bf16[16,100], index: 0, kind: input, shape index: {}]   ;;  %s477_s3 = inlined_call_operand.vmem [shape: bf16[32,16], index: 3, kind: input, shape index: {}]   ;;  %s478_s2 = inlined_call_operand.vmem [shape: f32[1,32], index: 2, kind: input, shape index: {}]   ;;  %s479_s5 = inlined_call_operand.vmem [shape: bf16[16,1], index: 5, kind: input, shape index: {}]   ;;  %s480_s6 = inlined_call_operand.<no memory space> [shape: f32[1,1], index: 6, kind: input, shape index: {}]   ;;  %s481_s4 = inlined_call_operand.vmem [shape: f32[1,16], index: 4, kind: input, shape index: {}]   ;;  %s482_s7 = inlined_call_operand.vmem [shape: f32[16,1], index: 7, kind: output, shape index: {}]  }
   0x1   :  { %329 = vmatprep.subr.bf16.mxu0 %v382_v0  ;;  %v363_v1 = vld [vmem:[%s475_s1] sm:$0xff]   ;;  %343 = vmatprep.mubr.msk.bf16.mxu0 %vm383_vm0, %v382_v0  ;;  %v364_v2 = vld [vmem:[%s475_s1 + $0x8] sm:$0xff]   ;;  %v365_v3 = vld [vmem:[%s475_s1 + $0x10] sm:$0xff]   ;;  %vm170_vm3 = vcmask 261120   ;;  %v12_v23 = vstv %s480_s6  ;;  %vm233_vm4 = vcmask 130048   ;;  %vm290_vm5 = vcmask 7168  }
   0x2   :  { %347 = vmatprep.subr.bf16.mxu1 %v382_v0  ;;  %351 = vmatprep.mubr.msk.bf16.mxu1 %vm383_vm0, %v382_v0  ;;  %v366_v4 = vld [vmem:[%s475_s1 + $0x18] sm:$0xff]   ;;  %v367_v5 = vld [vmem:[%s475_s1 + $0x20] sm:$0xff]   ;;  %v368_v6 = vld [vmem:[%s475_s1 + $0x28] sm:$0xff]   ;;  %13 = vst [vmem:[#allocation2] sm:$0x1] %v12_v23 }
   0x3   :  { %330 = vmatpush3.bf16.msra.mxu0 %v363_v1  ;;  %v369_v7 = vld [vmem:[%s475_s1 + $0x30] ss:$0 sps:$4 sm:$0x33]   ;;  %v370_v9 = vld [vmem:[%s476_s0] sm:$0xff]   ;;  %v372_v11 = vld [vmem:[%s477_s3 + $0x8] sm:$0xff]  }
   0x4   :  { %331 = vmatprep.subr.bf16.mxu0 %v382_v0  ;;  %v101_v8 = vsel %vm99_vm1, %v369_v7, 0  ;;  %v371_v10 = vld [vmem:[%s477_s3] sm:$0xff]  }
   0x5   :  { %348 = vmatpush3.bf16.msra.mxu1 %v371_v10  ;;  %v297_v12 = vld [vmem:[%s478_s2] ss:$0 sm:$0xff] }
   0x6   :  { %349 = vmatprep.subr.bf16.mxu1 %v382_v0  ;;  %v373_v22 = vld [vmem:[%s479_s5] sm:$0xff]  }
   0x7   :  { %332 = vmatpush3.bf16.msra.mxu0 %v364_v2  ;;  %v307_v24 = vld [vmem:[%s481_s4] ss:$0 sm:$0xff] }
   0x8   :  { %333 = vmatprep.subr.bf16.mxu0 %v382_v0 }
   0x9   :  { %350 = vmatpush3.bf16.msra.mxu1 %v372_v11  ;;  %v311_v34 = vld [vmem:[#allocation2] ss:$0 sm:$0xff] }
   0xa   :  { %355 = vmatprep.subr.bf16.mxu1 %v382_v0 }
   0xb   :  { %334 = vmatpush3.bf16.msra.mxu0 %v365_v3 }
   0xc   :  { %335 = vmatprep.subr.bf16.mxu0 %v382_v0 }
   0xf   :  { %336 = vmatpush3.bf16.msra.mxu0 %v366_v4 }
  0x10   :  { %337 = vmatprep.subr.bf16.mxu0 %v382_v0 }
  0x13   :  { %338 = vmatpush3.bf16.msra.mxu0 %v367_v5 }
  0x14   :  { %339 = vmatprep.subr.bf16.mxu0 %v382_v0 }
  0x17   :  { %340 = vmatpush3.bf16.msra.mxu0 %v368_v6 }
  0x18   :  { %341 = vmatprep.subr.bf16.mxu0 %v382_v0 }
  0x1b   :  { %342 = vmatpush3.bf16.msra.mxu0 %v101_v8 }
  0x1e   :  { %344 = vmatmul.mubr.msk.bf16.vlgmr.msra.gmra.mrb[0].mxu0 %vm95_vm2, %v370_v9 }
  0xf1   :  { %v137_v13 = vpop.f32.mrb[0].mxu0 }
  0xf2   :  { %v138_v14 = vadd.f32 %v297_v12, %v137_v13  ;;  %v345_v15 = vpop.f32.mrb[1].mxu0 }
  0xf3   :  { %v140_v16 = vpop.f32.mrb[2].mxu0 }
  0xf4   :  { %v141_v17 = vadd.f32 %v297_v12, %v140_v16  ;;  %v346_v18 = vpop.f32.mrb[3].mxu0  ;;  %v144_v19 = vmax.f32 %v138_v14, 0.0 }
  0xf6   :  { %v145_v20 = vmax.f32 %v141_v17, 0.0 }
  0xf8   :  { %v146_v21 = vpack.c.bf16 %v145_v20, %v144_v19 }
  0xfa   :  { %352 = vmatmul.mubr.msk.bf16.vlgmr.msra.gmra.mrb[0].mxu1 %vm170_vm3, %v146_v21 }
  0xfb   :  { %357 = vmatprep.mubr.msk.bf16.mxu1 %vm383_vm0, %v382_v0  ;;  %356 = vmatpush3.bf16.msra.mxu1 %v373_v22 }
 0x1cd   :  { %v208_v25 = vpop.f32.mrb[0].mxu1 }
 0x1ce   :  { %v209_v26 = vadd.f32 %v307_v24, %v208_v25  ;;  %v353_v27 = vpop.f32.mrb[1].mxu1 }
 0x1cf   :  { %v211_v28 = vpop.f32.mrb[2].mxu1 }
 0x1d0   :  { %v212_v29 = vadd.f32 %v307_v24, %v211_v28  ;;  %v354_v30 = vpop.f32.mrb[3].mxu1  ;;  %v215_v31 = vmax.f32 %v209_v26, 0.0 }
 0x1d2   :  { %v216_v32 = vmax.f32 %v212_v29, 0.0 }
 0x1d4   :  { %v217_v33 = vpack.c.bf16 %v216_v32, %v215_v31 }
 0x1d6   :  { %358 = vmatmul.mubr.msk.bf16.vlgmr.msra.gmra.mrb[4].mxu1 %vm233_vm4, %v217_v33 }
 0x2a9   :  { %v271_v35 = vpop.f32.mrb[4].mxu1 }
 0x2aa   :  { %v272_v36 = vadd.f32 %v311_v34, %v271_v35  ;;  %v359_v37 = vpop.f32.mrb[5].mxu1 }
 0x2ab   :  { %v274_v38 = vpop.f32.mrb[6].mxu1 }
 0x2ac   :  { %v314_v39 = vmul.f32 -1.442695, %v272_v36  ;;  %v275_v40 = vadd.f32 %v311_v34, %v274_v38  ;;  %v360_v41 = vpop.f32.mrb[7].mxu1 }
 0x2ae   :  { %374 = vpow2.f32 %v314_v39  ;;  %v315_v42 = vmul.f32 -1.442695, %v275_v40 }
 0x2b0   :  { %376 = vpow2.f32 %v315_v42 }
 0x2b8   :  { %v375_v43 = vpop.eup %374 }
 0x2b9   :  { %v284_v44 = vadd.f32 1.0, %v375_v43 }
 0x2ba   :  { %v377_v45 = vpop.eup %376 }
 0x2bb   :  { %378 = vrcp.f32 %v284_v44  ;;  %v285_v46 = vadd.f32 1.0, %v377_v45 }
 0x2bd   :  { %380 = vrcp.f32 %v285_v46 }
 0x2c5   :  { %v379_v47 = vpop.eup %378 }
 0x2c6   :  { %291 = vst.msk [vmem:[%s482_s7] sm:$0xff] %vm290_vm5, %v379_v47 }
 0x2c7   :  { %v381_v48 = vpop.eup %380 }
 0x2c8   :  { %292 = vst.msk [vmem:[%s482_s7 + $0x8] sm:$0xff] %vm290_vm5, %v381_v48 }

</bundles_post_ra>
